<compile_context>
chip_gen: v6e
topology: v6e:2x2x1
jax: 0.10.0
libtpu: 0.0.40
codegen_flags: <defaults>
</compile_context>

<pallas_src>
import functools
import math

import jax
import jax.numpy as jnp
from jax.experimental import pallas as pl
from jax.experimental.pallas import tpu as pltpu

# MXU operand / activation dtype (bf16 peak on v5e/v6e/v7x).  Accumulation, softmax
# and LayerNorm math remain f32 inside the kernels.
MATMUL_DTYPE = jnp.bfloat16
ACT_DTYPE = jnp.bfloat16


def _tile_and_pad(dim, target, base):
    """Pick a tile for `dim`: full-dim if small, else the largest multiple of `base`
    <= target that divides dim; if none exists, pad `dim` up to a tile multiple.
    Returns (tile, padded_dim)."""
    if dim <= target:
        return dim, dim                       # full-dim blocks are always legal
    t = (target // base) * base
    while t >= base:
        if dim % t == 0:
            return t, dim
        t -= base
    t = (target // base) * base               # no divisor: pad instead of a huge block
    padded = ((dim + t - 1) // t) * t
    return t, padded


# ----------------------------- Pallas kernels -----------------------------

def _matmul_kernel(x_ref, w_ref, b_ref, o_ref, acc_ref, *, activation):
    # Tiled y = x @ w + b (optional fused ReLU); f32 accumulator in VMEM scratch.
    @pl.when(pl.program_id(2) == 0)
    def _init():
        acc_ref[...] = jnp.zeros_like(acc_ref)

    acc_ref[...] += jnp.dot(x_ref[...], w_ref[...],
                            preferred_element_type=jnp.float32)

    @pl.when(pl.program_id(2) == pl.num_programs(2) - 1)
    def _finalize():
        y = acc_ref[...] + b_ref[...].astype(jnp.float32)
        if activation == "relu":
            y = jnp.maximum(y, 0.0)
        o_ref[...] = y.astype(o_ref.dtype)


def linear_pallas(x2d, w, b, activation=None, out_dtype=None,
                  tm_target=256, tn_target=256, tk_target=512):
    """y = act(x @ w + b). Output dtype follows ACT_DTYPE unless overridden."""
    out_dtype = ACT_DTYPE if out_dtype is None else out_dtype
    M, K = x2d.shape
    Kw, N = w.shape
    assert K == Kw
    tm, Mp = _tile_and_pad(M, tm_target, 8)
    tn, Np = _tile_and_pad(N, tn_target, 128)
    tk, Kp = _tile_and_pad(K, tk_target, 128)
    x2d = x2d.astype(MATMUL_DTYPE)            # no-op: activations already bf16
    w = w.astype(MATMUL_DTYPE)                # no-op: params pre-cast at init
    b2 = b.reshape(1, N).astype(jnp.float32)
    if Mp != M or Kp != K:
        x2d = jnp.pad(x2d, ((0, Mp - M), (0, Kp - K)))
    if Kp != K or Np != N:
        w = jnp.pad(w, ((0, Kp - K), (0, Np - N)))
    if Np != N:
        b2 = jnp.pad(b2, ((0, 0), (0, Np - N)))
    out = pl.pallas_call(
        functools.partial(_matmul_kernel, activation=activation),
        out_shape=jax.ShapeDtypeStruct((Mp, Np), out_dtype),
        grid=(Mp // tm, Np // tn, Kp // tk),
        in_specs=[
            pl.BlockSpec((tm, tk), lambda i, j, k: (i, k)),
            pl.BlockSpec((tk, tn), lambda i, j, k: (k, j)),
            pl.BlockSpec((1, tn), lambda i, j, k: (0, j)),
        ],
        out_specs=pl.BlockSpec((tm, tn), lambda i, j, k: (i, j)),
        scratch_shapes=[pltpu.VMEM((tm, tn), jnp.float32)],
        compiler_params=pltpu.CompilerParams(
            dimension_semantics=("parallel", "parallel", "arbitrary")),
    )(x2d, w, b2)
    if Mp != M or Np != N:
        out = out[:M, :N]
    return out


def _matmul_add_ln_kernel(x_ref, w_ref, b_ref, r_ref, g_ref, bt_ref, o_ref, acc_ref,
                          *, eps):
    # Tiled y = LayerNorm((x @ w + b) + residual); LN fused into the k==last epilogue.
    @pl.when(pl.program_id(1) == 0)
    def _init():
        acc_ref[...] = jnp.zeros_like(acc_ref)

    acc_ref[...] += jnp.dot(x_ref[...], w_ref[...],
                            preferred_element_type=jnp.float32)

    @pl.when(pl.program_id(1) == pl.num_programs(1) - 1)
    def _finalize():
        y = (acc_ref[...] + b_ref[...].astype(jnp.float32)
             + r_ref[...].astype(jnp.float32))
        mean = jnp.mean(y, axis=-1, keepdims=True)
        var = jnp.mean((y - mean) ** 2, axis=-1, keepdims=True)
        yn = (y - mean) * jax.lax.rsqrt(var + eps)
        o_ref[...] = (yn * g_ref[...].astype(jnp.float32)
                      + bt_ref[...].astype(jnp.float32)).astype(o_ref.dtype)


def linear_add_ln_pallas(x2d, w, b, res2d, gamma, beta, eps=1e-12,
                         tm_target=256, tk_target=512):
    """LayerNorm(x @ w + b + residual). N (= d_model) is kept as a single full block
    so the LN reduction lives entirely inside the matmul epilogue."""
    M, K = x2d.shape
    Kw, N = w.shape
    assert K == Kw and res2d.shape == (M, N)
    tm, Mp = _tile_and_pad(M, tm_target, 8)
    tk, Kp = _tile_and_pad(K, tk_target, 128)
    x2d = x2d.astype(MATMUL_DTYPE)
    w = w.astype(MATMUL_DTYPE)
    res2d = res2d.astype(MATMUL_DTYPE)
    if Mp != M or Kp != K:
        x2d = jnp.pad(x2d, ((0, Mp - M), (0, Kp - K)))
    if Kp != K:
        w = jnp.pad(w, ((0, Kp - K), (0, 0)))
    if Mp != M:
        res2d = jnp.pad(res2d, ((0, Mp - M), (0, 0)))
    out = pl.pallas_call(
        functools.partial(_matmul_add_ln_kernel, eps=eps),
        out_shape=jax.ShapeDtypeStruct((Mp, N), ACT_DTYPE),
        grid=(Mp // tm, Kp // tk),
        in_specs=[
            pl.BlockSpec((tm, tk), lambda i, k: (i, k)),
            pl.BlockSpec((tk, N), lambda i, k: (k, 0)),
            pl.BlockSpec((1, N), lambda i, k: (0, 0)),
            pl.BlockSpec((tm, N), lambda i, k: (i, 0)),
            pl.BlockSpec((1, N), lambda i, k: (0, 0)),
            pl.BlockSpec((1, N), lambda i, k: (0, 0)),
        ],
        out_specs=pl.BlockSpec((tm, N), lambda i, k: (i, 0)),
        scratch_shapes=[pltpu.VMEM((tm, N), jnp.float32)],
        compiler_params=pltpu.CompilerParams(
            dimension_semantics=("parallel", "arbitrary")),
    )(x2d, w, b.reshape(1, N).astype(jnp.float32), res2d,
      gamma.reshape(1, N).astype(jnp.float32),
      beta.reshape(1, N).astype(jnp.float32))
    return out[:M] if Mp != M else out


def _attn_kernel(q_ref, k_ref, v_ref, m_ref, o_ref, *, scale):
    # One (batch, head) slab per grid step; contiguous (S, dk) tiles, no lane slicing.
    q = q_ref[0, 0] * scale                       # (Sq, dk) bf16, scale folded in
    k = k_ref[0, 0]                               # (Sk, dk) bf16
    v = v_ref[0, 0]                               # (Sk, dk) bf16
    madd = m_ref[0]                               # (mq, Sk) f32 additive mask
    # q @ k^T, contracting on dk directly (no materialized transpose); f32 accumulate.
    s = jax.lax.dot_general(q, k, (((1,), (1,)), ((), ())),
                            preferred_element_type=jnp.float32)
    s = s + madd                                  # broadcasts over rows when mq == 1
    s = s - jnp.max(s, axis=-1, keepdims=True)
    p = jnp.exp(s)
    denom = jnp.sum(p, axis=-1, keepdims=True)
    p = p * pl.reciprocal(denom, approx=True)     # EUP fast path
    o_ref[0, 0] = jnp.dot(p.astype(v.dtype), v,
                          preferred_element_type=jnp.float32).astype(o_ref.dtype)


def attention_pallas(q, k, v, madd, scale):
    """q,k,v: (B, H, S, dk) head-major; madd: (B, mq, Sk) additive f32 mask."""
    B, H, Sq, dk = q.shape
    Sk = k.shape[2]
    mq = madd.shape[1]
    return pl.pallas_call(
        functools.partial(_attn_kernel, scale=scale),
        out_shape=jax.ShapeDtypeStruct((B, H, Sq, dk), ACT_DTYPE),
        grid=(B, H),
        in_specs=[
            pl.BlockSpec((1, 1, Sq, dk), lambda b, h: (b, h, 0, 0)),
            pl.BlockSpec((1, 1, Sk, dk), lambda b, h: (b, h, 0, 0)),
            pl.BlockSpec((1, 1, Sk, dk), lambda b, h: (b, h, 0, 0)),
            # mask shared across heads: block index ignores h -> DMA only when b changes
            pl.BlockSpec((1, mq, Sk), lambda b, h: (b, 0, 0)),
        ],
        out_specs=pl.BlockSpec((1, 1, Sq, dk), lambda b, h: (b, h, 0, 0)),
        compiler_params=pltpu.CompilerParams(
            dimension_semantics=("parallel", "parallel")),
    )(q, k, v, madd)


# ----------------------------- model glue -----------------------------

def sinusoidal_pos_encoding(max_len, d_model):
    pos = jnp.arange(max_len, dtype=jnp.float32)[:, None]
    i2 = jnp.arange(0, d_model, 2, dtype=jnp.float32)[None, :]
    angle = pos / jnp.power(10000.0, i2 / d_model)
    pe = jnp.zeros((max_len, d_model), dtype=jnp.float32)
    pe = pe.at[:, 0::2].set(jnp.sin(angle))
    pe = pe.at[:, 1::2].set(jnp.cos(angle))
    return pe


def self_attention_heads(x2d, madd, p, n_head, B, S):
    D = x2d.shape[1]
    dk = D // n_head
    # fused QKV projection: one matmul with (D, 3D) weight
    qkv = linear_pallas(x2d, p["w_qkv"], p["b_qkv"])                    # (B*S, 3D)
    qkv = qkv.reshape(B, S, 3, n_head, dk).transpose(2, 0, 3, 1, 4)     # (3, B, H, S, dk)
    o = attention_pallas(qkv[0], qkv[1], qkv[2], madd, 1.0 / math.sqrt(dk))
    return o.transpose(0, 2, 1, 3).reshape(B * S, D)                    # (B*S, D)


def cross_attention_heads(x2d, enc2d, madd, p, n_head, B, Sq, Sk):
    D = x2d.shape[1]
    dk = D // n_head
    q = linear_pallas(x2d, p["wq"], p["bq"])
    q = q.reshape(B, Sq, n_head, dk).transpose(0, 2, 1, 3)              # (B, H, Sq, dk)
    # fused KV projection (both read enc_src): one matmul with (D, 2D) weight
    kv = linear_pallas(enc2d, p["w_kv"], p["b_kv"])
    kv = kv.reshape(B, Sk, 2, n_head, dk).transpose(2, 0, 3, 1, 4)      # (2, B, H, Sk, dk)
    o = attention_pallas(q, kv[0], kv[1], madd, 1.0 / math.sqrt(dk))
    return o.transpose(0, 2, 1, 3).reshape(B * Sq, D)


def decoder_layer(x2d, enc2d, madd_trg, madd_src, lp, n_head, B, S_trg, S_src):
    # self-attention; out-proj + residual add + LayerNorm fused in one kernel
    sa = self_attention_heads(x2d, madd_trg, lp["self_attn"], n_head, B, S_trg)
    x2d = linear_add_ln_pallas(sa, lp["self_attn"]["wo"], lp["self_attn"]["bo"],
                               x2d, lp["ln1_g"], lp["ln1_b"])
    # cross-attention; fused out-proj + add + LN
    ca = cross_attention_heads(x2d, enc2d, madd_src, lp["cross_attn"], n_head,
                               B, S_trg, S_src)
    x2d = linear_add_ln_pallas(ca, lp["cross_attn"]["wo"], lp["cross_attn"]["bo"],
                               x2d, lp["ln2_g"], lp["ln2_b"])
    # position-wise FFN: ReLU fused into first matmul, add+LN fused into second
    h = linear_pallas(x2d, lp["w1"], lp["b1"], activation="relu")
    x2d = linear_add_ln_pallas(h, lp["w2"], lp["b2"], x2d, lp["ln3_g"], lp["ln3_b"])
    return x2d


def decoder_forward(trg_ids, enc_src, trg_mask, src_mask, params, n_head,
                    use_cache=False, cache=None):
    # TODO(synk): incremental-decoding cache path (use_cache=True) not implemented.
    assert not use_cache, "cache path not implemented"
    B, S = trg_ids.shape
    D = params["tok_emb"].shape[1]
    S_src = enc_src.shape[1]
    # embedding: token lookup (gather, plain JAX glue) + sinusoidal positions
    tok = jnp.take(params["tok_emb"], trg_ids, axis=0).astype(jnp.float32)  # (B, S, D)
    x2d = (tok + params["pos_emb"][:S][None, :, :]).astype(ACT_DTYPE).reshape(B * S, D)
    enc2d = enc_src.astype(ACT_DTYPE).reshape(B * S_src, D)
    # additive masks computed ONCE per forward (shared by every layer / head):
    # keep -> 0, masked -> -1e4 (matches masked_fill(mask == 0, -1e4) after softmax)
    madd_trg = (trg_mask[:, 0].astype(jnp.float32) - 1.0) * 10000.0   # (B, Sq, Sq)
    madd_src = (src_mask[:, 0].astype(jnp.float32) - 1.0) * 10000.0   # (B, 1, Sk)
    for lp in params["layers"]:
        x2d = decoder_layer(x2d, enc2d, madd_trg, madd_src, lp, n_head, B, S, S_src)
    # final vocab projection -- f32 logits
    out = linear_pallas(x2d, params["w_out"], params["b_out"], out_dtype=jnp.float32)
    V = params["w_out"].shape[1]
    return out.reshape(B, S, V)


# ----------------------------- param init -----------------------------

def init_params(key, vocab, max_len, d_model, ffn_hidden, n_layers):
    keys = iter(jax.random.split(key, 16 + n_layers * 32))

    def nrm(shape, scale=0.02, dtype=MATMUL_DTYPE):
        return (scale * jax.random.normal(next(keys), shape, dtype=jnp.float32)).astype(dtype)

    def vec(shape):
        return (0.02 * jax.random.normal(next(keys), shape, dtype=jnp.float32))

    def self_attn_params():
        wq, wk, wv = (nrm((d_model, d_model)) for _ in range(3))
        bq, bk, bv = (vec((d_model,)) for _ in range(3))
        return {
            "w_qkv": jnp.concatenate([wq, wk, wv], axis=1),   # fused QKV weight (D, 3D)
            "b_qkv": jnp.concatenate([bq, bk, bv], axis=0),
            "wo": nrm((d_model, d_model)), "bo": vec((d_model,)),
        }

    def cross_attn_params():
        wk, wv = nrm((d_model, d_model)), nrm((d_model, d_model))
        bk, bv = vec((d_model,)), vec((d_model,))
        return {
            "wq": nrm((d_model, d_model)), "bq": vec((d_model,)),
            "w_kv": jnp.concatenate([wk, wv], axis=1),         # fused KV weight (D, 2D)
            "b_kv": jnp.concatenate([bk, bv], axis=0),
            "wo": nrm((d_model, d_model)), "bo": vec((d_model,)),
        }

    tok_emb = nrm((vocab, d_model))
    tok_emb = tok_emb.at[1].set(0.0)   # padding_idx=1 row is zero at init
    layers = []
    for _ in range(n_layers):
        layers.append({
            "self_attn": self_attn_params(),
            "ln1_g": jnp.ones((d_model,), jnp.float32), "ln1_b": jnp.zeros((d_model,), jnp.float32),
            "cross_attn": cross_attn_params(),
            "ln2_g": jnp.ones((d_model,), jnp.float32), "ln2_b": jnp.zeros((d_model,), jnp.float32),
            "w1": nrm((d_model, ffn_hidden)), "b1": vec((ffn_hidden,)),
            "w2": nrm((ffn_hidden, d_model)), "b2": vec((d_model,)),
            "ln3_g": jnp.ones((d_model,), jnp.float32), "ln3_b": jnp.zeros((d_model,), jnp.float32),
        })
    return {
        "tok_emb": tok_emb,                                    # bf16 (gather in bf16)
        "pos_emb": sinusoidal_pos_encoding(max_len, d_model),  # f32 (added in f32)
        "layers": layers,
        "w_out": nrm((d_model, vocab)),
        "b_out": vec((vocab,)),
    }


# ----------------------------- main -----------------------------

if __name__ == "__main__":
    B, S_trg, S_src = 2, 8, 8
    d_model, ffn_hidden, n_head, n_layers = 32, 64, 4, 2
    vocab, max_len = 64, 16

    key = jax.random.PRNGKey(0)
    k_par, k_ids, k_enc = jax.random.split(key, 3)

    params = init_params(k_par, vocab, max_len, d_model, ffn_hidden, n_layers)
    trg_ids = jax.random.randint(k_ids, (B, S_trg), 0, vocab, dtype=jnp.int32)
    enc_src = jax.random.normal(k_enc, (B, S_src, d_model), dtype=jnp.float32)

    # causal target mask (B, 1, S_trg, S_trg); full source mask (B, 1, 1, S_src)
    causal = jnp.tril(jnp.ones((S_trg, S_trg), jnp.float32))
    trg_mask = jnp.broadcast_to(causal, (B, 1, S_trg, S_trg))
    src_mask = jnp.ones((B, 1, 1, S_src), jnp.float32)

    logits = decoder_forward(trg_ids, enc_src, trg_mask, src_mask, params, n_head,
                             use_cache=False, cache=None)
    jax.block_until_ready(logits)
    assert logits.shape == (B, S_trg, vocab)
    assert bool(jnp.all(jnp.isfinite(logits)))
    print("KERNEL_OK")
</pallas_src>

<mosaic_0001>
module attributes {stable_mosaic.version = 11 : i64} {
  func.func @_matmul_kernel(%arg0: i32, %arg1: i32, %arg2: i32, %arg3: memref<16x32xbf16, #tpu.memory_space<vmem>>, %arg4: memref<32x96xbf16, #tpu.memory_space<vmem>>, %arg5: memref<1x96xf32, #tpu.memory_space<vmem>>, %arg6: memref<16x96xbf16, #tpu.memory_space<vmem>>, %arg7: memref<16x96xf32, #tpu.memory_space<vmem>>) attributes {dimension_semantics = [#tpu.dimension_semantics<parallel>, #tpu.dimension_semantics<parallel>, #tpu.dimension_semantics<arbitrary>], iteration_bounds = array<i64: 1, 1, 1>, scalar_prefetch = 0 : i64, scratch_operands = 1 : i64, tpu.core_type = #tpu.core_type<tc>, window_params = [{transform_indices = @transform_0, window_bounds = array<i64: 16, 32>}, {transform_indices = @transform_1, window_bounds = array<i64: 32, 96>}, {transform_indices = @transform_2, window_bounds = array<i64: 1, 96>}, {transform_indices = @transform_3, window_bounds = array<i64: 16, 96>}]} {
    %c0_i32 = arith.constant 0 : i32
    %0 = arith.cmpi eq, %arg2, %c0_i32 : i32
    %1 = arith.extui %0 : i1 to i32
    %c0_i32_0 = arith.constant 0 : i32
    %2 = arith.cmpi ne, %1, %c0_i32_0 : i32
    scf.if %2 {
      %cst_10 = arith.constant 0.000000e+00 : f32
      %12 = vector.broadcast %cst_10 : f32 to vector<16x96xf32>
      %c0_11 = arith.constant 0 : index
      %c0_12 = arith.constant 0 : index
      %13 = vector.load %arg7[%c0_11, %c0_12] : memref<16x96xf32, #tpu.memory_space<vmem>>, vector<16x96xf32>
      tpu.vector_store %arg7[%c0_11, %c0_12], %12 {strides = array<i32>} : memref<16x96xf32, #tpu.memory_space<vmem>>, vector<16x96xf32>,
    } else {
    }
    %c0 = arith.constant 0 : index
    %c0_1 = arith.constant 0 : index
    %3 = vector.load %arg7[%c0, %c0_1] : memref<16x96xf32, #tpu.memory_space<vmem>>, vector<16x96xf32>
    %c0_2 = arith.constant 0 : index
    %c0_3 = arith.constant 0 : index
    %4 = vector.load %arg3[%c0_2, %c0_3] : memref<16x32xbf16, #tpu.memory_space<vmem>>, vector<16x32xbf16>
    %c0_4 = arith.constant 0 : index
    %c0_5 = arith.constant 0 : index
    %5 = vector.load %arg4[%c0_4, %c0_5] : memref<32x96xbf16, #tpu.memory_space<vmem>>, vector<32x96xbf16>
    %cst = arith.constant dense<0.000000e+00> : vector<16x96xf32>
    %6 = tpu.matmul %4, %5, %cst {dimension_numbers = #tpu.dot_dimension_numbers<[1], [0], [0], [1], [0, 0, 1, 1], [], []>} : vector<16x32xbf16>, vector<32x96xbf16>, vector<16x96xf32> -> vector<16x96xf32>
    %7 = arith.addf %3, %6 : vector<16x96xf32>
    %c0_6 = arith.constant 0 : index
    %c0_7 = arith.constant 0 : index
    %8 = vector.load %arg7[%c0_6, %c0_7] : memref<16x96xf32, #tpu.memory_space<vmem>>, vector<16x96xf32>
    tpu.vector_store %arg7[%c0_6, %c0_7], %7 {strides = array<i32>} : memref<16x96xf32, #tpu.memory_space<vmem>>, vector<16x96xf32>,
    %c0_i32_8 = arith.constant 0 : i32
    %9 = arith.cmpi eq, %arg2, %c0_i32_8 : i32
    %10 = arith.extui %9 : i1 to i32
    %c0_i32_9 = arith.constant 0 : i32
    %11 = arith.cmpi ne, %10, %c0_i32_9 : i32
    scf.if %11 {
      %c0_10 = arith.constant 0 : index
      %c0_11 = arith.constant 0 : index
      %12 = vector.load %arg7[%c0_10, %c0_11] : memref<16x96xf32, #tpu.memory_space<vmem>>, vector<16x96xf32>
      %c0_12 = arith.constant 0 : index
      %c0_13 = arith.constant 0 : index
      %13 = vector.load %arg5[%c0_12, %c0_13] : memref<1x96xf32, #tpu.memory_space<vmem>>, vector<1x96xf32>
      %14 = vector.broadcast %13 : vector<1x96xf32> to vector<16x96xf32>
      %15 = arith.addf %12, %14 : vector<16x96xf32>
      %16 = arith.truncf %15 : vector<16x96xf32> to vector<16x96xbf16>
      %c0_14 = arith.constant 0 : index
      %c0_15 = arith.constant 0 : index
      %17 = vector.load %arg6[%c0_14, %c0_15] : memref<16x96xbf16, #tpu.memory_space<vmem>>, vector<16x96xbf16>
      tpu.vector_store %arg6[%c0_14, %c0_15], %16 {strides = array<i32>} : memref<16x96xbf16, #tpu.memory_space<vmem>>, vector<16x96xbf16>,
    } else {
    }
    return
  }
  func.func @transform_0(%arg0: i32, %arg1: i32, %arg2: i32) -> (i32, i32) {
    %c0_i32 = arith.constant 0 : i32
    return %arg0, %arg2 : i32, i32
  }
  func.func @transform_1(%arg0: i32, %arg1: i32, %arg2: i32) -> (i32, i32) {
    %c0_i32 = arith.constant 0 : i32
    return %arg2, %arg1 : i32, i32
  }
  func.func @transform_2(%arg0: i32, %arg1: i32, %arg2: i32) -> (i32, i32) {
    %c0_i32 = arith.constant 0 : i32
    %c0_i32_0 = arith.constant 0 : i32
    return %c0_i32, %arg1 : i32, i32
  }
  func.func @transform_3(%arg0: i32, %arg1: i32, %arg2: i32) -> (i32, i32) {
    %c0_i32 = arith.constant 0 : i32
    return %arg0, %arg1 : i32, i32
  }
}

</mosaic_0001>

<bundles_post_ra>
// kernel: tpu_custom_call.1
= control target key start
LH: loop header
LB: loop body
LE: loop exit
PB: predicated region body
PF: predicated region fallthrough
CT: control target
= control target key end

     0   :  { %8 = vsyncpa [#allocation4], 0  ;;  %s317_s0 = inlined_call_operand.hbm [shape: bf16[16,32], index: 0, kind: input, shape index: {}]   ;;  %s318_s1 = inlined_call_operand.hbm [shape: bf16[32,96], index: 1, kind: input, shape index: {}]   ;;  %s319_s2 = inlined_call_operand.vmem [shape: f32[1,96], index: 2, kind: input, shape index: {}]   ;;  %s320_s3 = inlined_call_operand.hbm [shape: bf16[16,96], index: 3, kind: output, shape index: {}]  }
   0x1   :  { %9 = vsyncpa [#allocation7], 0 }
   0x2   :  { %10 = vsyncpa [#allocation5], 0  ;;  %s265_s12 = smov [#allocation3]  }
   0x3   :  { %s16_s13 = sshll.u32 %s265_s12, 4  ;;  %s17_s13 = int_to_ptr.vmem [resolvable:$true] %s16_s13 }
   0x4   :  { %s207_s14 = scalar_lea.vmem %s17_s13, 128  ;;  %p212_p1 = scmp.lt.s32.totalorder %s17_s13, %s17_s13 }
   0x5   :  { %p208_p0 = scmp.ne.s32.totalorder %s17_s13, %s207_s14  ;;  %p213_p2 = scmp.lt.s32.totalorder %s207_s14, %s207_s14 }
   0x7   :  { %p214_p3 = por %p213_p2, %p212_p1 }
   0x9   :  { %p215_p4 = pnand %p214_p3, %p208_p0 }
   0xb   :  { %218 = shalt.err (!%p215_p4)
}
   0xc   :  { %s266_s15 = smov 64   ;;  %s267_s16 = smov 4  }
   0xd   :  { %22 = dma.hbm_to_vmem [thread:$0]  %s317_s0, 128, %s17_s13, [#allocation4], %s266_s15, %s266_s15, %s267_s16  }
   0xe   :  { %s268_s19 = smov [#allocation6]  }
   0xf   :  { %s28_s20 = sshll.u32 %s268_s19, 4  ;;  %s29_s20 = int_to_ptr.vmem [resolvable:$true] %s28_s20 }
  0x10   :  { %s227_s21 = scalar_lea.vmem %s29_s20, 256  ;;  %p232_p6 = scmp.lt.s32.totalorder %s29_s20, %s29_s20 }
  0x11   :  { %p228_p5 = scmp.ne.s32.totalorder %s29_s20, %s227_s21  ;;  %p233_p7 = scmp.lt.s32.totalorder %s227_s21, %s227_s21 }
  0x13   :  { %p234_p8 = por %p233_p7, %p232_p6 }
  0x15   :  { %p235_p9 = pnand %p234_p8, %p228_p5 }
  0x17   :  { %238 = shalt.err (!%p235_p9)
}
  0x18   :  { %34 = dma.hbm_to_vmem [thread:$0]  %s318_s1, 256, %s29_s20, [#allocation7], %s266_s15, %s266_s15, %s267_s16  }
  0x19   :  { %259 = dma.done.wait [#allocation4], 128  }
  0x1a   :  { %260 = vsyncadd [#allocation4], 4294967168 }
  0x1b   :  { %261 = dma.done.wait [#allocation7], 256  }
  0x1c   :  { %262 = vsyncadd [#allocation7], 4294967040  ;;  %vm48_vm0 = vcmask 785408   ;;  %v269_v0 = vmov 0.0   ;;  %vm270_vm1 = vmmov 0   ;;  %v196_v1 = vld [vmem:[#allocation6 + $0x8] sm:$0xff]  }
  0x1d   :  { %49 = vst.msk [vmem:[#allocation2] sm:$0xff] %vm48_vm0, %v269_v0  ;;  %50 = vst.msk [vmem:[#allocation2 + $0x8] sm:$0xff] %vm48_vm0, %v269_v0  ;;  %181 = vmatprep.subr.bf16.mxu0 %v269_v0  ;;  %185 = vmatprep.mubr.msk.bf16.mxu0 %vm270_vm1, %v269_v0  ;;  %v197_v2 = vld [vmem:[#allocation6] sm:$0xff]   ;;  %v198_v3 = vld [vmem:[#allocation3] sm:$0xff]   ;;  %vm76_vm2 = vcmask 261120   ;;  %vm148_vm3 = vcmask 781312  }
  0x1e   :  { %182 = vmatpush3.bf16.msra.mxu0 %v196_v1  ;;  %v173_v12 = vld [vmem:[%s319_s2] ss:$0 sm:$0xff]  ;;  %s271_s24 = smov [#allocation8]  }
  0x1f   :  { %183 = vmatprep.subr.bf16.mxu0 %v269_v0  ;;  %s156_s25 = sshll.u32 %s271_s24, 4  ;;  %s157_s25 = int_to_ptr.vmem [resolvable:$true] %s156_s25 }
  0x20   :  { %s239_s26 = scalar_lea.vmem %s157_s25, 128  ;;  %p244_p11 = scmp.lt.s32.totalorder %s157_s25, %s157_s25 }
  0x21   :  { %p240_p10 = scmp.ne.s32.totalorder %s157_s25, %s239_s26  ;;  %p245_p12 = scmp.lt.s32.totalorder %s239_s26, %s239_s26 }
  0x22   :  { %184 = vmatpush3.bf16.msra.mxu0 %v197_v2 }
  0x23   :  { %p246_p13 = por %p245_p12, %p244_p11 }
  0x24   :  { %v51_v4 = vld [vmem:[#allocation2] sm:$0xff]  ;;  %v52_v8 = vld [vmem:[#allocation2 + $0x8] sm:$0xff] }
  0x25   :  { %186 = vmatmul.mubr.msk.bf16.vlgmr.msra.gmra.mxu0 %vm76_vm2, %v198_v3  ;;  %p247_p0 = pnand %p246_p13, %p240_p10 }
  0xe5   :  { %v114_v5 = vpop.f32.mrf.mxu0 }
  0xe6   :  { %v121_v6 = vadd.f32 %v114_v5, %v51_v4 }
  0xe7   :  { %v187_v7 = vpop.f32.mrf.mxu0 }
  0xe8   :  { %124 = vst.msk [vmem:[#allocation2] sm:$0xff] %vm48_vm0, %v121_v6 }
  0xe9   :  { %v117_v9 = vpop.f32.mrf.mxu0 }
  0xea   :  { %v122_v10 = vadd.f32 %v117_v9, %v52_v8 }
  0xeb   :  { %v188_v11 = vpop.f32.mrf.mxu0 }
  0xec   :  { %125 = vst.msk [vmem:[#allocation2 + $0x8] sm:$0xff] %vm48_vm0, %v122_v10 }
  0xef   :  { %v129_v13 = vld [vmem:[#allocation2] sm:$0xff] }
  0xf0   :  { %v138_v14 = vadd.f32 %v173_v12, %v129_v13 }
  0xf2   :  { %v176_v15 = vpack.c.bf16 %v138_v14, %v138_v14 }
  0xf3   :  { %v130_v16 = vld [vmem:[#allocation2 + $0x8] sm:$0xff] }
  0xf4   :  { %v139_v17 = vadd.f32 %v173_v12, %v130_v16  ;;  %149 = vst.msk [vmem:[#allocation8] sm:$0xf] %vm148_vm3, %v176_v15 }
  0xf6   :  { %v177_v18 = vpack.c.bf16 %v139_v17, %v139_v17 }
  0xf8   :  { %150 = vst.msk [vmem:[#allocation8 + $0x4] sm:$0xf] %vm148_vm3, %v177_v18 }
  0xf9   :  { %250 = shalt.err (!%p247_p0)
}
  0xfa   :  { %162 = dma.vmem_to_hbm [thread:$0]  %s157_s25, 128, %s320_s3, [#allocation5], %s266_s15, %s266_s15, %s267_s16  }
  0xfb   :  { %263 = dma.done.wait [#allocation5], 128  }
  0xfc   :  { %264 = vsyncadd [#allocation5], 4294967168 }
  0xfd   :  { %166 = vsyncpa [#allocation4], 1 }
  0xfe   :  { %167 = vsyncpa [#allocation7], 1 }
  0xff   :  { %168 = vsyncpa [#allocation5], 1 }

</bundles_post_ra>
